<compile_context>
chip_gen: v5e
topology: v5e:2x2
jax: 0.10.0
libtpu: 0.0.40
codegen_flags: <defaults>
</compile_context>

<pallas_src>
import functools

import jax
import jax.numpy as jnp
from jax.experimental import pallas as pl
from jax.experimental.pallas import tpu as pltpu  # noqa: F401  (TPU backend import)


# --------------------------------------------------------------------------------------
# Fused kernel: q/k/v projections -> per-head softmax attention -> output projection
#               -> residual + BN1 -> Dense FF (ReLU) -> residual + BN2
# Everything lives in VMEM / vregs for the whole layer (tiny shapes).
# --------------------------------------------------------------------------------------
def fused_layer_kernel(xq_ref, xkv_ref,
                       wq_ref, wk_ref, wv_ref, bq_ref, bk_ref, bv_ref,
                       wo_ref, bo_ref,
                       gamma1_ref, beta1_ref,
                       w1_ref, b1_ref, w2_ref, b2_ref,
                       gamma2_ref, beta2_ref,
                       out_ref, attn_ref,
                       *, nhead, batch, tq, tk, eps=1e-5):
    emb = xq_ref.shape[-1]
    hd = emb // nhead
    scale = 1.0 / float(hd) ** 0.5
    nrows = batch * tq

    xq = xq_ref[...]                      # [B*Tq, E]
    xkv = xkv_ref[...]                    # [B*Tk, E]

    # ---- q/k/v projections: batch folded into the sublane (row) dim ----
    q = (jnp.dot(xq, wq_ref[...], preferred_element_type=jnp.float32)
         + bq_ref[...]).reshape(batch, tq, emb)
    k = (jnp.dot(xkv, wk_ref[...], preferred_element_type=jnp.float32)
         + bk_ref[...]).reshape(batch, tk, emb)
    v = (jnp.dot(xkv, wv_ref[...], preferred_element_type=jnp.float32)
         + bv_ref[...]).reshape(batch, tk, emb)

    wo = wo_ref[...]                      # [E, E]

    # ---- per-head attention, batched over B, all in registers ----
    attn_sum = jnp.zeros((batch, tq, tk), jnp.float32)
    mha = jnp.zeros((nrows, emb), jnp.float32)
    for h in range(nhead):                # static loop (nhead is small)
        lo = h * hd
        qh = q[:, :, lo:lo + hd] * scale                    # [B, Tq, hd]
        kh = k[:, :, lo:lo + hd]                            # [B, Tk, hd]
        vh = v[:, :, lo:lo + hd]                            # [B, Tk, hd]
        s = jnp.einsum('bqd,bkd->bqk', qh, kh,
                       preferred_element_type=jnp.float32)  # [B, Tq, Tk]
        s = s - jnp.max(s, axis=-1, keepdims=True)
        e = jnp.exp(s)
        # softmax normalization on the EUP slot (approx reciprocal)
        w = e * pl.reciprocal(jnp.sum(e, axis=-1, keepdims=True), approx=True)
        attn_sum = attn_sum + w
        ctx_h = jnp.einsum('bqk,bkd->bqd', w, vh,
                           preferred_element_type=jnp.float32)  # [B, Tq, hd]
        # per-head partial output projection (no lane-sliced ctx scratch)
        mha = mha + jnp.dot(ctx_h.reshape(nrows, hd), wo[lo:lo + hd, :],
                            preferred_element_type=jnp.float32)

    mha = mha + bo_ref[...]
    attn_ref[...] = (attn_sum * (1.0 / nhead)).astype(attn_ref.dtype)

    # ---- residual + BatchNorm1d #1 (per-channel stats over all B*Tq rows) ----
    x1 = mha + xq
    mean1 = jnp.sum(x1, axis=0, keepdims=True) * (1.0 / nrows)
    d1 = x1 - mean1
    var1 = jnp.sum(d1 * d1, axis=0, keepdims=True) * (1.0 / nrows)
    y1 = d1 * jax.lax.rsqrt(var1 + eps) * gamma1_ref[...] + beta1_ref[...]

    # ---- Dense feed-forward: ReLU(x @ W1 + b1) @ W2 + b2 ----
    hmid = jnp.dot(y1, w1_ref[...], preferred_element_type=jnp.float32) + b1_ref[...]
    hmid = jnp.maximum(hmid, 0.0)
    ff = jnp.dot(hmid, w2_ref[...], preferred_element_type=jnp.float32) + b2_ref[...]

    # ---- residual + BatchNorm1d #2 ----
    x2 = y1 + ff
    mean2 = jnp.sum(x2, axis=0, keepdims=True) * (1.0 / nrows)
    d2 = x2 - mean2
    var2 = jnp.sum(d2 * d2, axis=0, keepdims=True) * (1.0 / nrows)
    y2 = d2 * jax.lax.rsqrt(var2 + eps) * gamma2_ref[...] + beta2_ref[...]

    out_ref[...] = y2.astype(out_ref.dtype)


def attention_encoder_layer(queries, keys_values, params, nhead):
    B, Tq, E = queries.shape
    Tk = keys_values.shape[1]
    kern = functools.partial(fused_layer_kernel, nhead=nhead, batch=B, tq=Tq, tk=Tk)
    # Single fused kernel, no grid: the whole layer's activations are only a few KiB.
    # NOTE: the batch cannot be split across TensorCores without a cross-core
    # reduction because BatchNorm statistics couple every (B, Tq) row.
    out2d, attn = pl.pallas_call(
        kern,
        out_shape=(jax.ShapeDtypeStruct((B * Tq, E), jnp.float32),
                   jax.ShapeDtypeStruct((B, Tq, Tk), jnp.float32)),
    )(queries.reshape(B * Tq, E), keys_values.reshape(B * Tk, E),
      params["wq"], params["wk"], params["wv"],
      params["bq"], params["bk"], params["bv"],
      params["wo"], params["bo"],
      params["gamma1"], params["beta1"],
      params["w1"], params["b1"], params["w2"], params["b2"],
      params["gamma2"], params["beta2"])
    return out2d.reshape(B, Tq, E), attn


# --------------------------------------------------------------------------------------
# Parameters (weights stored transposed: y = x @ W + b)
# --------------------------------------------------------------------------------------
def init_params(key, emb_dim, hidden_dim):
    ks = jax.random.split(key, 10)
    u = lambda k, shape, s: (jax.random.uniform(k, shape, jnp.float32) - 0.5) * s
    E, H = emb_dim, hidden_dim
    return dict(
        # MHA projection weights
        wq=u(ks[0], (E, E), 0.2), wk=u(ks[1], (E, E), 0.2), wv=u(ks[2], (E, E), 0.2),
        bq=jnp.zeros((1, E), jnp.float32),
        bk=jnp.zeros((1, E), jnp.float32),
        bv=jnp.zeros((1, E), jnp.float32),
        wo=u(ks[3], (E, E), 0.2),
        bo=jnp.zeros((1, E), jnp.float32),
        # Dense: Linear weights are [ins, outs], init (rand - 0.5) * 0.05 as in the module
        w1=u(ks[4], (E, H), 0.05), b1=u(ks[5], (1, H), 0.05),
        w2=u(ks[6], (H, E), 0.05), b2=u(ks[7], (1, E), 0.05),
        # BatchNorm affine params (PyTorch default init: gamma=1, beta=0)
        gamma1=jnp.ones((1, E), jnp.float32), beta1=jnp.zeros((1, E), jnp.float32),
        gamma2=jnp.ones((1, E), jnp.float32), beta2=jnp.zeros((1, E), jnp.float32),
    )


# --------------------------------------------------------------------------------------
# Pure-JAX reference (exact arithmetic) for a correctness cross-check.
# --------------------------------------------------------------------------------------
def reference_layer(queries, keys_values, params, nhead, eps=1e-5):
    B, Tq, E = queries.shape
    Tk = keys_values.shape[1]
    hd = E // nhead
    xq = queries.reshape(B * Tq, E)
    xkv = keys_values.reshape(B * Tk, E)
    q = (xq @ params["wq"] + params["bq"]).reshape(B, Tq, nhead, hd).transpose(0, 2, 1, 3)
    k = (xkv @ params["wk"] + params["bk"]).reshape(B, Tk, nhead, hd).transpose(0, 2, 1, 3)
    v = (xkv @ params["wv"] + params["bv"]).reshape(B, Tk, nhead, hd).transpose(0, 2, 1, 3)
    s = jnp.einsum('bhqd,bhkd->bhqk', q, k) / jnp.sqrt(jnp.float32(hd))
    w = jax.nn.softmax(s, axis=-1)
    ctx = jnp.einsum('bhqk,bhkd->bhqd', w, v).transpose(0, 2, 1, 3).reshape(B * Tq, E)
    mha = ctx @ params["wo"] + params["bo"]
    attn = jnp.mean(w, axis=1)

    def bn(x, g, b):
        mean = x.mean(axis=0, keepdims=True)
        var = ((x - mean) ** 2).mean(axis=0, keepdims=True)
        return (x - mean) / jnp.sqrt(var + eps) * g + b

    x1 = bn(mha + xq, params["gamma1"], params["beta1"])
    h = jnp.maximum(x1 @ params["w1"] + params["b1"], 0.0)
    ff = h @ params["w2"] + params["b2"]
    x2 = bn(x1 + ff, params["gamma2"], params["beta2"])
    return x2.reshape(B, Tq, E), attn


if __name__ == "__main__":
    B, Tq, Tk, E, H, NHEAD = 2, 8, 8, 32, 64, 4

    key = jax.random.PRNGKey(0)
    kq, kkv, kp = jax.random.split(key, 3)
    queries = jax.random.normal(kq, (B, Tq, E), jnp.float32)
    keys_values = jax.random.normal(kkv, (B, Tk, E), jnp.float32)
    params = init_params(kp, E, H)

    out, attn = attention_encoder_layer(queries, keys_values, params, NHEAD)
    jax.block_until_ready((out, attn))

    assert out.shape == (B, Tq, E), out.shape
    assert attn.shape == (B, Tq, Tk), attn.shape
    assert jnp.all(jnp.isfinite(out)) and jnp.all(jnp.isfinite(attn))
    # head-averaged attention rows sum to ~1 (approx reciprocal in kernel)
    assert jnp.allclose(jnp.sum(attn, axis=-1), 1.0, atol=5e-3)

    # cross-check against an exact pure-JAX reference (loose tol: approx reciprocal)
    out_ref, attn_ref = reference_layer(queries, keys_values, params, NHEAD)
    assert jnp.allclose(out, out_ref, atol=5e-2, rtol=5e-2)
    assert jnp.allclose(attn, attn_ref, atol=5e-3, rtol=5e-3)

    print("KERNEL_OK")
</pallas_src>

<mosaic_0001>
module attributes {stable_mosaic.version = 11 : i64} {
  func.func @fused_layer_kernel(%arg0: memref<16x32xf32, #tpu.memory_space<vmem>>, %arg1: memref<16x32xf32, #tpu.memory_space<vmem>>, %arg2: memref<32x32xf32, #tpu.memory_space<vmem>>, %arg3: memref<32x32xf32, #tpu.memory_space<vmem>>, %arg4: memref<32x32xf32, #tpu.memory_space<vmem>>, %arg5: memref<1x32xf32, #tpu.memory_space<vmem>>, %arg6: memref<1x32xf32, #tpu.memory_space<vmem>>, %arg7: memref<1x32xf32, #tpu.memory_space<vmem>>, %arg8: memref<32x32xf32, #tpu.memory_space<vmem>>, %arg9: memref<1x32xf32, #tpu.memory_space<vmem>>, %arg10: memref<1x32xf32, #tpu.memory_space<vmem>>, %arg11: memref<1x32xf32, #tpu.memory_space<vmem>>, %arg12: memref<32x64xf32, #tpu.memory_space<vmem>>, %arg13: memref<1x64xf32, #tpu.memory_space<vmem>>, %arg14: memref<64x32xf32, #tpu.memory_space<vmem>>, %arg15: memref<1x32xf32, #tpu.memory_space<vmem>>, %arg16: memref<1x32xf32, #tpu.memory_space<vmem>>, %arg17: memref<1x32xf32, #tpu.memory_space<vmem>>, %arg18: memref<16x32xf32, #tpu.memory_space<vmem>>, %arg19: memref<2x8x8xf32, #tpu.memory_space<vmem>>) attributes {dimension_semantics = [], scalar_prefetch = 0 : i64, scratch_operands = 0 : i64, tpu.core_type = #tpu.core_type<tc>} {
    %c0 = arith.constant 0 : index
    %c0_0 = arith.constant 0 : index
    %0 = vector.load %arg0[%c0, %c0_0] : memref<16x32xf32, #tpu.memory_space<vmem>>, vector<16x32xf32>
    %c0_1 = arith.constant 0 : index
    %c0_2 = arith.constant 0 : index
    %1 = vector.load %arg1[%c0_1, %c0_2] : memref<16x32xf32, #tpu.memory_space<vmem>>, vector<16x32xf32>
    %c0_3 = arith.constant 0 : index
    %c0_4 = arith.constant 0 : index
    %2 = vector.load %arg2[%c0_3, %c0_4] : memref<32x32xf32, #tpu.memory_space<vmem>>, vector<32x32xf32>
    %cst = arith.constant dense<0.000000e+00> : vector<16x32xf32>
    %3 = tpu.matmul %0, %2, %cst {dimension_numbers = #tpu.dot_dimension_numbers<[1], [0], [0], [1], [0, 0, 1, 1], [], []>} : vector<16x32xf32>, vector<32x32xf32>, vector<16x32xf32> -> vector<16x32xf32>
    %c0_5 = arith.constant 0 : index
    %c0_6 = arith.constant 0 : index
    %4 = vector.load %arg5[%c0_5, %c0_6] : memref<1x32xf32, #tpu.memory_space<vmem>>, vector<1x32xf32>
    %5 = vector.broadcast %4 : vector<1x32xf32> to vector<16x32xf32>
    %6 = arith.addf %3, %5 : vector<16x32xf32>
    %7 = vector.shape_cast %6 : vector<16x32xf32> to vector<2x8x32xf32>
    %c0_7 = arith.constant 0 : index
    %c0_8 = arith.constant 0 : index
    %8 = vector.load %arg3[%c0_7, %c0_8] : memref<32x32xf32, #tpu.memory_space<vmem>>, vector<32x32xf32>
    %cst_9 = arith.constant dense<0.000000e+00> : vector<16x32xf32>
    %9 = tpu.matmul %1, %8, %cst_9 {dimension_numbers = #tpu.dot_dimension_numbers<[1], [0], [0], [1], [0, 0, 1, 1], [], []>} : vector<16x32xf32>, vector<32x32xf32>, vector<16x32xf32> -> vector<16x32xf32>
    %c0_10 = arith.constant 0 : index
    %c0_11 = arith.constant 0 : index
    %10 = vector.load %arg6[%c0_10, %c0_11] : memref<1x32xf32, #tpu.memory_space<vmem>>, vector<1x32xf32>
    %11 = vector.broadcast %10 : vector<1x32xf32> to vector<16x32xf32>
    %12 = arith.addf %9, %11 : vector<16x32xf32>
    %13 = vector.shape_cast %12 : vector<16x32xf32> to vector<2x8x32xf32>
    %c0_12 = arith.constant 0 : index
    %c0_13 = arith.constant 0 : index
    %14 = vector.load %arg4[%c0_12, %c0_13] : memref<32x32xf32, #tpu.memory_space<vmem>>, vector<32x32xf32>
    %cst_14 = arith.constant dense<0.000000e+00> : vector<16x32xf32>
    %15 = tpu.matmul %1, %14, %cst_14 {dimension_numbers = #tpu.dot_dimension_numbers<[1], [0], [0], [1], [0, 0, 1, 1], [], []>} : vector<16x32xf32>, vector<32x32xf32>, vector<16x32xf32> -> vector<16x32xf32>
    %c0_15 = arith.constant 0 : index
    %c0_16 = arith.constant 0 : index
    %16 = vector.load %arg7[%c0_15, %c0_16] : memref<1x32xf32, #tpu.memory_space<vmem>>, vector<1x32xf32>
    %17 = vector.broadcast %16 : vector<1x32xf32> to vector<16x32xf32>
    %18 = arith.addf %15, %17 : vector<16x32xf32>
    %19 = vector.shape_cast %18 : vector<16x32xf32> to vector<2x8x32xf32>
    %c0_17 = arith.constant 0 : index
    %c0_18 = arith.constant 0 : index
    %20 = vector.load %arg8[%c0_17, %c0_18] : memref<32x32xf32, #tpu.memory_space<vmem>>, vector<32x32xf32>
    %cst_19 = arith.constant 0.000000e+00 : f32
    %21 = vector.broadcast %cst_19 : f32 to vector<2x8x8xf32>
    %cst_20 = arith.constant 0.000000e+00 : f32
    %22 = vector.broadcast %cst_20 : f32 to vector<16x32xf32>
    %23 = vector.extract_strided_slice %7 {offsets = [0, 0, 0], sizes = [2, 8, 8], strides = [1, 1, 1]} : vector<2x8x32xf32> to vector<2x8x8xf32>
    %cst_21 = arith.constant 0.353553385 : f32
    %24 = vector.broadcast %cst_21 : f32 to vector<2x8x8xf32>
    %25 = arith.mulf %23, %24 : vector<2x8x8xf32>
    %26 = vector.extract_strided_slice %13 {offsets = [0, 0, 0], sizes = [2, 8, 8], strides = [1, 1, 1]} : vector<2x8x32xf32> to vector<2x8x8xf32>
    %27 = vector.extract_strided_slice %19 {offsets = [0, 0, 0], sizes = [2, 8, 8], strides = [1, 1, 1]} : vector<2x8x32xf32> to vector<2x8x8xf32>
    "tpu.trace_start"() <{level = 10 : i32, message = "bqd,bkd->bqk"}> : () -> ()
    %cst_22 = arith.constant dense<0.000000e+00> : vector<2x8x8xf32>
    %28 = tpu.matmul %25, %26, %cst_22 {dimension_numbers = #tpu.dot_dimension_numbers<[2], [2], [1], [1], [0, 0, 0, 1, 1, 1], [0], [0]>} : vector<2x8x8xf32>, vector<2x8x8xf32>, vector<2x8x8xf32> -> vector<2x8x8xf32>
    "tpu.trace_stop"() : () -> ()
    %cst_23 = arith.constant dense<0xFF800000> : vector<2x8xf32>
    %29 = vector.multi_reduction <maximumf>, %28, %cst_23 [2] : vector<2x8x8xf32> to vector<2x8xf32>
    %30 = vector.shape_cast %29 : vector<2x8xf32> to vector<2x8x1xf32>
    %31 = vector.broadcast %30 : vector<2x8x1xf32> to vector<2x8x8xf32>
    %32 = arith.subf %28, %31 : vector<2x8x8xf32>
    %33 = math.exp %32 : vector<2x8x8xf32>
    %cst_24 = arith.constant dense<0.000000e+00> : vector<2x8xf32>
    %34 = vector.multi_reduction <add>, %33, %cst_24 [2] : vector<2x8x8xf32> to vector<2x8xf32>
    %35 = vector.shape_cast %34 : vector<2x8xf32> to vector<2x8x1xf32>
    %36 = tpu.reciprocal %35 {approx = true} : vector<2x8x1xf32> -> vector<2x8x1xf32>
    %37 = vector.broadcast %36 : vector<2x8x1xf32> to vector<2x8x8xf32>
    %38 = arith.mulf %33, %37 : vector<2x8x8xf32>
    %39 = arith.addf %21, %38 : vector<2x8x8xf32>
    "tpu.trace_start"() <{level = 10 : i32, message = "bqk,bkd->bqd"}> : () -> ()
    %cst_25 = arith.constant dense<0.000000e+00> : vector<2x8x8xf32>
    %40 = tpu.matmul %38, %27, %cst_25 {dimension_numbers = #tpu.dot_dimension_numbers<[2], [1], [1], [2], [0, 0, 0, 1, 1, 2], [0], [0]>} : vector<2x8x8xf32>, vector<2x8x8xf32>, vector<2x8x8xf32> -> vector<2x8x8xf32>
    "tpu.trace_stop"() : () -> ()
    %41 = vector.shape_cast %40 : vector<2x8x8xf32> to vector<16x8xf32>
    %42 = vector.extract_strided_slice %20 {offsets = [0, 0], sizes = [8, 32], strides = [1, 1]} : vector<32x32xf32> to vector<8x32xf32>
    %cst_26 = arith.constant dense<0.000000e+00> : vector<16x32xf32>
    %43 = tpu.matmul %41, %42, %cst_26 {dimension_numbers = #tpu.dot_dimension_numbers<[1], [0], [0], [1], [0, 0, 1, 1], [], []>} : vector<16x8xf32>, vector<8x32xf32>, vector<16x32xf32> -> vector<16x32xf32>
    %44 = arith.addf %22, %43 : vector<16x32xf32>
    %45 = vector.extract_strided_slice %7 {offsets = [0, 0, 8], sizes = [2, 8, 8], strides = [1, 1, 1]} : vector<2x8x32xf32> to vector<2x8x8xf32>
    %cst_27 = arith.constant 0.353553385 : f32
    %46 = vector.broadcast %cst_27 : f32 to vector<2x8x8xf32>
    %47 = arith.mulf %45, %46 : vector<2x8x8xf32>
    %48 = vector.extract_strided_slice %13 {offsets = [0, 0, 8], sizes = [2, 8, 8], strides = [1, 1, 1]} : vector<2x8x32xf32> to vector<2x8x8xf32>
    %49 = vector.extract_strided_slice %19 {offsets = [0, 0, 8], sizes = [2, 8, 8], strides = [1, 1, 1]} : vector<2x8x32xf32> to vector<2x8x8xf32>
    "tpu.trace_start"() <{level = 10 : i32, message = "bqd,bkd->bqk"}> : () -> ()
    %cst_28 = arith.constant dense<0.000000e+00> : vector<2x8x8xf32>
    %50 = tpu.matmul %47, %48, %cst_28 {dimension_numbers = #tpu.dot_dimension_numbers<[2], [2], [1], [1], [0, 0, 0, 1, 1, 1], [0], [0]>} : vector<2x8x8xf32>, vector<2x8x8xf32>, vector<2x8x8xf32> -> vector<2x8x8xf32>
    "tpu.trace_stop"() : () -> ()
    %cst_29 = arith.constant dense<0xFF800000> : vector<2x8xf32>
    %51 = vector.multi_reduction <maximumf>, %50, %cst_29 [2] : vector<2x8x8xf32> to vector<2x8xf32>
    %52 = vector.shape_cast %51 : vector<2x8xf32> to vector<2x8x1xf32>
    %53 = vector.broadcast %52 : vector<2x8x1xf32> to vector<2x8x8xf32>
    %54 = arith.subf %50, %53 : vector<2x8x8xf32>
    %55 = math.exp %54 : vector<2x8x8xf32>
    %cst_30 = arith.constant dense<0.000000e+00> : vector<2x8xf32>
    %56 = vector.multi_reduction <add>, %55, %cst_30 [2] : vector<2x8x8xf32> to vector<2x8xf32>
    %57 = vector.shape_cast %56 : vector<2x8xf32> to vector<2x8x1xf32>
    %58 = tpu.reciprocal %57 {approx = true} : vector<2x8x1xf32> -> vector<2x8x1xf32>
    %59 = vector.broadcast %58 : vector<2x8x1xf32> to vector<2x8x8xf32>
    %60 = arith.mulf %55, %59 : vector<2x8x8xf32>
    %61 = arith.addf %39, %60 : vector<2x8x8xf32>
    "tpu.trace_start"() <{level = 10 : i32, message = "bqk,bkd->bqd"}> : () -> ()
    %cst_31 = arith.constant dense<0.000000e+00> : vector<2x8x8xf32>
    %62 = tpu.matmul %60, %49, %cst_31 {dimension_numbers = #tpu.dot_dimension_numbers<[2], [1], [1], [2], [0, 0, 0, 1, 1, 2], [0], [0]>} : vector<2x8x8xf32>, vector<2x8x8xf32>, vector<2x8x8xf32> -> vector<2x8x8xf32>
    "tpu.trace_stop"() : () -> ()
    %63 = vector.shape_cast %62 : vector<2x8x8xf32> to vector<16x8xf32>
    %64 = vector.extract_strided_slice %20 {offsets = [8, 0], sizes = [8, 32], strides = [1, 1]} : vector<32x32xf32> to vector<8x32xf32>
    %cst_32 = arith.constant dense<0.000000e+00> : vector<16x32xf32>
    %65 = tpu.matmul %63, %64, %cst_32 {dimension_numbers = #tpu.dot_dimension_numbers<[1], [0], [0], [1], [0, 0, 1, 1], [], []>} : vector<16x8xf32>, vector<8x32xf32>, vector<16x32xf32> -> vector<16x32xf32>
    %66 = arith.addf %44, %65 : vector<16x32xf32>
    %67 = vector.extract_strided_slice %7 {offsets = [0, 0, 16], sizes = [2, 8, 8], strides = [1, 1, 1]} : vector<2x8x32xf32> to vector<2x8x8xf32>
    %cst_33 = arith.constant 0.353553385 : f32
    %68 = vector.broadcast %cst_33 : f32 to vector<2x8x8xf32>
    %69 = arith.mulf %67, %68 : vector<2x8x8xf32>
    %70 = vector.extract_strided_slice %13 {offsets = [0, 0, 16], sizes = [2, 8, 8], strides = [1, 1, 1]} : vector<2x8x32xf32> to vector<2x8x8xf32>
    %71 = vector.extract_strided_slice %19 {offsets = [0, 0, 16], sizes = [2, 8, 8], strides = [1, 1, 1]} : vector<2x8x32xf32> to vector<2x8x8xf32>
    "tpu.trace_start"() <{level = 10 : i32, message = "bqd,bkd->bqk"}> : () -> ()
    %cst_34 = arith.constant dense<0.000000e+00> : vector<2x8x8xf32>
    %72 = tpu.matmul %69, %70, %cst_34 {dimension_numbers = #tpu.dot_dimension_numbers<[2], [2], [1], [1], [0, 0, 0, 1, 1, 1], [0], [0]>} : vector<2x8x8xf32>, vector<2x8x8xf32>, vector<2x8x8xf32> -> vector<2x8x8xf32>
    "tpu.trace_stop"() : () -> ()
    %cst_35 = arith.constant dense<0xFF800000> : vector<2x8xf32>
    %73 = vector.multi_reduction <maximumf>, %72, %cst_35 [2] : vector<2x8x8xf32> to vector<2x8xf32>
    %74 = vector.shape_cast %73 : vector<2x8xf32> to vector<2x8x1xf32>
    %75 = vector.broadcast %74 : vector<2x8x1xf32> to vector<2x8x8xf32>
    %76 = arith.subf %72, %75 : vector<2x8x8xf32>
    %77 = math.exp %76 : vector<2x8x8xf32>
    %cst_36 = arith.constant dense<0.000000e+00> : vector<2x8xf32>
    %78 = vector.multi_reduction <add>, %77, %cst_36 [2] : vector<2x8x8xf32> to vector<2x8xf32>
    %79 = vector.shape_cast %78 : vector<2x8xf32> to vector<2x8x1xf32>
    %80 = tpu.reciprocal %79 {approx = true} : vector<2x8x1xf32> -> vector<2x8x1xf32>
    %81 = vector.broadcast %80 : vector<2x8x1xf32> to vector<2x8x8xf32>
    %82 = arith.mulf %77, %81 : vector<2x8x8xf32>
    %83 = arith.addf %61, %82 : vector<2x8x8xf32>
    "tpu.trace_start"() <{level = 10 : i32, message = "bqk,bkd->bqd"}> : () -> ()
    %cst_37 = arith.constant dense<0.000000e+00> : vector<2x8x8xf32>
    %84 = tpu.matmul %82, %71, %cst_37 {dimension_numbers = #tpu.dot_dimension_numbers<[2], [1], [1], [2], [0, 0, 0, 1, 1, 2], [0], [0]>} : vector<2x8x8xf32>, vector<2x8x8xf32>, vector<2x8x8xf32> -> vector<2x8x8xf32>
    "tpu.trace_stop"() : () -> ()
    %85 = vector.shape_cast %84 : vector<2x8x8xf32> to vector<16x8xf32>
    %86 = vector.extract_strided_slice %20 {offsets = [16, 0], sizes = [8, 32], strides = [1, 1]} : vector<32x32xf32> to vector<8x32xf32>
    %cst_38 = arith.constant dense<0.000000e+00> : vector<16x32xf32>
    %87 = tpu.matmul %85, %86, %cst_38 {dimension_numbers = #tpu.dot_dimension_numbers<[1], [0], [0], [1], [0, 0, 1, 1], [], []>} : vector<16x8xf32>, vector<8x32xf32>, vector<16x32xf32> -> vector<16x32xf32>
    %88 = arith.addf %66, %87 : vector<16x32xf32>
    %89 = vector.extract_strided_slice %7 {offsets = [0, 0, 24], sizes = [2, 8, 8], strides = [1, 1, 1]} : vector<2x8x32xf32> to vector<2x8x8xf32>
    %cst_39 = arith.constant 0.353553385 : f32
    %90 = vector.broadcast %cst_39 : f32 to vector<2x8x8xf32>
    %91 = arith.mulf %89, %90 : vector<2x8x8xf32>
    %92 = vector.extract_strided_slice %13 {offsets = [0, 0, 24], sizes = [2, 8, 8], strides = [1, 1, 1]} : vector<2x8x32xf32> to vector<2x8x8xf32>
    %93 = vector.extract_strided_slice %19 {offsets = [0, 0, 24], sizes = [2, 8, 8], strides = [1, 1, 1]} : vector<2x8x32xf32> to vector<2x8x8xf32>
    "tpu.trace_start"() <{level = 10 : i32, message = "bqd,bkd->bqk"}> : () -> ()
    %cst_40 = arith.constant dense<0.000000e+00> : vector<2x8x8xf32>
    %94 = tpu.matmul %91, %92, %cst_40 {dimension_numbers = #tpu.dot_dimension_numbers<[2], [2], [1], [1], [0, 0, 0, 1, 1, 1], [0], [0]>} : vector<2x8x8xf32>, vector<2x8x8xf32>, vector<2x8x8xf32> -> vector<2x8x8xf32>
    "tpu.trace_stop"() : () -> ()
    %cst_41 = arith.constant dense<0xFF800000> : vector<2x8xf32>
    %95 = vector.multi_reduction <maximumf>, %94, %cst_41 [2] : vector<2x8x8xf32> to vector<2x8xf32>
    %96 = vector.shape_cast %95 : vector<2x8xf32> to vector<2x8x1xf32>
    %97 = vector.broadcast %96 : vector<2x8x1xf32> to vector<2x8x8xf32>
    %98 = arith.subf %94, %97 : vector<2x8x8xf32>
    %99 = math.exp %98 : vector<2x8x8xf32>
    %cst_42 = arith.constant dense<0.000000e+00> : vector<2x8xf32>
    %100 = vector.multi_reduction <add>, %99, %cst_42 [2] : vector<2x8x8xf32> to vector<2x8xf32>
    %101 = vector.shape_cast %100 : vector<2x8xf32> to vector<2x8x1xf32>
    %102 = tpu.reciprocal %101 {approx = true} : vector<2x8x1xf32> -> vector<2x8x1xf32>
    %103 = vector.broadcast %102 : vector<2x8x1xf32> to vector<2x8x8xf32>
    %104 = arith.mulf %99, %103 : vector<2x8x8xf32>
    %105 = arith.addf %83, %104 : vector<2x8x8xf32>
    "tpu.trace_start"() <{level = 10 : i32, message = "bqk,bkd->bqd"}> : () -> ()
    %cst_43 = arith.constant dense<0.000000e+00> : vector<2x8x8xf32>
    %106 = tpu.matmul %104, %93, %cst_43 {dimension_numbers = #tpu.dot_dimension_numbers<[2], [1], [1], [2], [0, 0, 0, 1, 1, 2], [0], [0]>} : vector<2x8x8xf32>, vector<2x8x8xf32>, vector<2x8x8xf32> -> vector<2x8x8xf32>
    "tpu.trace_stop"() : () -> ()
    %107 = vector.shape_cast %106 : vector<2x8x8xf32> to vector<16x8xf32>
    %108 = vector.extract_strided_slice %20 {offsets = [24, 0], sizes = [8, 32], strides = [1, 1]} : vector<32x32xf32> to vector<8x32xf32>
    %cst_44 = arith.constant dense<0.000000e+00> : vector<16x32xf32>
    %109 = tpu.matmul %107, %108, %cst_44 {dimension_numbers = #tpu.dot_dimension_numbers<[1], [0], [0], [1], [0, 0, 1, 1], [], []>} : vector<16x8xf32>, vector<8x32xf32>, vector<16x32xf32> -> vector<16x32xf32>
    %110 = arith.addf %88, %109 : vector<16x32xf32>
    %c0_45 = arith.constant 0 : index
    %c0_46 = arith.constant 0 : index
    %111 = vector.load %arg9[%c0_45, %c0_46] : memref<1x32xf32, #tpu.memory_space<vmem>>, vector<1x32xf32>
    %112 = vector.broadcast %111 : vector<1x32xf32> to vector<16x32xf32>
    %113 = arith.addf %110, %112 : vector<16x32xf32>
    %cst_47 = arith.constant 2.500000e-01 : f32
    %114 = vector.broadcast %cst_47 : f32 to vector<2x8x8xf32>
    %115 = arith.mulf %105, %114 : vector<2x8x8xf32>
    %c0_48 = arith.constant 0 : index
    %c0_49 = arith.constant 0 : index
    %c0_50 = arith.constant 0 : index
    %116 = vector.load %arg19[%c0_48, %c0_49, %c0_50] : memref<2x8x8xf32, #tpu.memory_space<vmem>>, vector<2x8x8xf32>
    tpu.vector_store %arg19[%c0_48, %c0_49, %c0_50], %115 {strides = array<i32>} : memref<2x8x8xf32, #tpu.memory_space<vmem>>, vector<2x8x8xf32>,
    %117 = arith.addf %113, %0 : vector<16x32xf32>
    %cst_51 = arith.constant dense<0.000000e+00> : vector<32xf32>
    %118 = vector.multi_reduction <add>, %117, %cst_51 [0] : vector<16x32xf32> to vector<32xf32>
    %119 = vector.shape_cast %118 : vector<32xf32> to vector<1x32xf32>
    %cst_52 = arith.constant 6.250000e-02 : f32
    %120 = vector.broadcast %cst_52 : f32 to vector<1x32xf32>
    %121 = arith.mulf %119, %120 : vector<1x32xf32>
    %122 = vector.broadcast %121 : vector<1x32xf32> to vector<16x32xf32>
    %123 = arith.subf %117, %122 : vector<16x32xf32>
    %124 = arith.mulf %123, %123 : vector<16x32xf32>
    %cst_53 = arith.constant dense<0.000000e+00> : vector<32xf32>
    %125 = vector.multi_reduction <add>, %124, %cst_53 [0] : vector<16x32xf32> to vector<32xf32>
    %126 = vector.shape_cast %125 : vector<32xf32> to vector<1x32xf32>
    %cst_54 = arith.constant 6.250000e-02 : f32
    %127 = vector.broadcast %cst_54 : f32 to vector<1x32xf32>
    %128 = arith.mulf %126, %127 : vector<1x32xf32>
    %cst_55 = arith.constant 9.99999974E-6 : f32
    %129 = vector.broadcast %cst_55 : f32 to vector<1x32xf32>
    %130 = arith.addf %128, %129 : vector<1x32xf32>
    %131 = math.rsqrt %130 : vector<1x32xf32>
    %132 = vector.broadcast %131 : vector<1x32xf32> to vector<16x32xf32>
    %133 = arith.mulf %123, %132 : vector<16x32xf32>
    %c0_56 = arith.constant 0 : index
    %c0_57 = arith.constant 0 : index
    %134 = vector.load %arg10[%c0_56, %c0_57] : memref<1x32xf32, #tpu.memory_space<vmem>>, vector<1x32xf32>
    %135 = vector.broadcast %134 : vector<1x32xf32> to vector<16x32xf32>
    %136 = arith.mulf %133, %135 : vector<16x32xf32>
    %c0_58 = arith.constant 0 : index
    %c0_59 = arith.constant 0 : index
    %137 = vector.load %arg11[%c0_58, %c0_59] : memref<1x32xf32, #tpu.memory_space<vmem>>, vector<1x32xf32>
    %138 = vector.broadcast %137 : vector<1x32xf32> to vector<16x32xf32>
    %139 = arith.addf %136, %138 : vector<16x32xf32>
    %c0_60 = arith.constant 0 : index
    %c0_61 = arith.constant 0 : index
    %140 = vector.load %arg12[%c0_60, %c0_61] : memref<32x64xf32, #tpu.memory_space<vmem>>, vector<32x64xf32>
    %cst_62 = arith.constant dense<0.000000e+00> : vector<16x64xf32>
    %141 = tpu.matmul %139, %140, %cst_62 {dimension_numbers = #tpu.dot_dimension_numbers<[1], [0], [0], [1], [0, 0, 1, 1], [], []>} : vector<16x32xf32>, vector<32x64xf32>, vector<16x64xf32> -> vector<16x64xf32>
    %c0_63 = arith.constant 0 : index
    %c0_64 = arith.constant 0 : index
    %142 = vector.load %arg13[%c0_63, %c0_64] : memref<1x64xf32, #tpu.memory_space<vmem>>, vector<1x64xf32>
    %143 = vector.broadcast %142 : vector<1x64xf32> to vector<16x64xf32>
    %144 = arith.addf %141, %143 : vector<16x64xf32>
    %cst_65 = arith.constant 0.000000e+00 : f32
    %145 = vector.broadcast %cst_65 : f32 to vector<16x64xf32>
    %146 = arith.maximumf %144, %145 : vector<16x64xf32>
    %c0_66 = arith.constant 0 : index
    %c0_67 = arith.constant 0 : index
    %147 = vector.load %arg14[%c0_66, %c0_67] : memref<64x32xf32, #tpu.memory_space<vmem>>, vector<64x32xf32>
    %cst_68 = arith.constant dense<0.000000e+00> : vector<16x32xf32>
    %148 = tpu.matmul %146, %147, %cst_68 {dimension_numbers = #tpu.dot_dimension_numbers<[1], [0], [0], [1], [0, 0, 1, 1], [], []>} : vector<16x64xf32>, vector<64x32xf32>, vector<16x32xf32> -> vector<16x32xf32>
    %c0_69 = arith.constant 0 : index
    %c0_70 = arith.constant 0 : index
    %149 = vector.load %arg15[%c0_69, %c0_70] : memref<1x32xf32, #tpu.memory_space<vmem>>, vector<1x32xf32>
    %150 = vector.broadcast %149 : vector<1x32xf32> to vector<16x32xf32>
    %151 = arith.addf %148, %150 : vector<16x32xf32>
    %152 = arith.addf %139, %151 : vector<16x32xf32>
    %cst_71 = arith.constant dense<0.000000e+00> : vector<32xf32>
    %153 = vector.multi_reduction <add>, %152, %cst_71 [0] : vector<16x32xf32> to vector<32xf32>
    %154 = vector.shape_cast %153 : vector<32xf32> to vector<1x32xf32>
    %cst_72 = arith.constant 6.250000e-02 : f32
    %155 = vector.broadcast %cst_72 : f32 to vector<1x32xf32>
    %156 = arith.mulf %154, %155 : vector<1x32xf32>
    %157 = vector.broadcast %156 : vector<1x32xf32> to vector<16x32xf32>
    %158 = arith.subf %152, %157 : vector<16x32xf32>
    %159 = arith.mulf %158, %158 : vector<16x32xf32>
    %cst_73 = arith.constant dense<0.000000e+00> : vector<32xf32>
    %160 = vector.multi_reduction <add>, %159, %cst_73 [0] : vector<16x32xf32> to vector<32xf32>
    %161 = vector.shape_cast %160 : vector<32xf32> to vector<1x32xf32>
    %cst_74 = arith.constant 6.250000e-02 : f32
    %162 = vector.broadcast %cst_74 : f32 to vector<1x32xf32>
    %163 = arith.mulf %161, %162 : vector<1x32xf32>
    %cst_75 = arith.constant 9.99999974E-6 : f32
    %164 = vector.broadcast %cst_75 : f32 to vector<1x32xf32>
    %165 = arith.addf %163, %164 : vector<1x32xf32>
    %166 = math.rsqrt %165 : vector<1x32xf32>
    %167 = vector.broadcast %166 : vector<1x32xf32> to vector<16x32xf32>
    %168 = arith.mulf %158, %167 : vector<16x32xf32>
    %c0_76 = arith.constant 0 : index
    %c0_77 = arith.constant 0 : index
    %169 = vector.load %arg16[%c0_76, %c0_77] : memref<1x32xf32, #tpu.memory_space<vmem>>, vector<1x32xf32>
    %170 = vector.broadcast %169 : vector<1x32xf32> to vector<16x32xf32>
    %171 = arith.mulf %168, %170 : vector<16x32xf32>
    %c0_78 = arith.constant 0 : index
    %c0_79 = arith.constant 0 : index
    %172 = vector.load %arg17[%c0_78, %c0_79] : memref<1x32xf32, #tpu.memory_space<vmem>>, vector<1x32xf32>
    %173 = vector.broadcast %172 : vector<1x32xf32> to vector<16x32xf32>
    %174 = arith.addf %171, %173 : vector<16x32xf32>
    %c0_80 = arith.constant 0 : index
    %c0_81 = arith.constant 0 : index
    %175 = vector.load %arg18[%c0_80, %c0_81] : memref<16x32xf32, #tpu.memory_space<vmem>>, vector<16x32xf32>
    tpu.vector_store %arg18[%c0_80, %c0_81], %174 {strides = array<i32>} : memref<16x32xf32, #tpu.memory_space<vmem>>, vector<16x32xf32>,
    return
  }
}

</mosaic_0001>

<bundles_post_ra>
// kernel: tpu_custom_call.1
= control target key start
LH: loop header
LB: loop body
LE: loop exit
PB: predicated region body
PF: predicated region fallthrough
CT: control target
= control target key end

     0   :  { %s1766_s0 = inlined_call_operand.hbm [shape: f32[16,32], index: 0, kind: input, shape index: {}]   ;;  %s1767_s1 = inlined_call_operand.hbm [shape: f32[16,32], index: 1, kind: input, shape index: {}]   ;;  %s1768_s2 = inlined_call_operand.vmem [shape: f32[32,32], index: 2, kind: input, shape index: {}]   ;;  %s1769_s3 = inlined_call_operand.vmem [shape: f32[32,32], index: 3, kind: input, shape index: {}]   ;;  %s1770_s4 = inlined_call_operand.vmem [shape: f32[32,32], index: 4, kind: input, shape index: {}]   ;;  %s1771_s5 = inlined_call_operand.vmem [shape: f32[1,32], index: 5, kind: input, shape index: {}]   ;;  %s1772_s6 = inlined_call_operand.vmem [shape: f32[1,32], index: 6, kind: input, shape index: {}]   ;;  %s1773_s7 = inlined_call_operand.vmem [shape: f32[1,32], index: 7, kind: input, shape index: {}]   ;;  %s1774_s8 = inlined_call_operand.hbm [shape: f32[32,32], index: 8, kind: input, shape index: {}]   ;;  %s1775_s9 = inlined_call_operand.vmem [shape: f32[1,32], index: 9, kind: input, shape index: {}]   ;;  %s1776_s10 = inlined_call_operand.vmem [shape: f32[1,32], index: 10, kind: input, shape index: {}]   ;;  %s1777_s11 = inlined_call_operand.vmem [shape: f32[1,32], index: 11, kind: input, shape index: {}]   ;;  %s1778_s12 = inlined_call_operand.hbm [shape: f32[32,64], index: 12, kind: input, shape index: {}]   ;;  %s1779_s13 = inlined_call_operand.vmem [shape: f32[1,64], index: 13, kind: input, shape index: {}]   ;;  %s1780_s14 = inlined_call_operand.vmem [shape: f32[64,32], index: 14, kind: input, shape index: {}]   ;;  %s1781_s15 = inlined_call_operand.vmem [shape: f32[1,32], index: 15, kind: input, shape index: {}]   ;;  %s1782_s16 = inlined_call_operand.vmem [shape: f32[1,32], index: 16, kind: input, shape index: {}]   ;;  %s1783_s17 = inlined_call_operand.vmem [shape: f32[1,32], index: 17, kind: input, shape index: {}]   ;;  %s1784_s18 = inlined_call_operand.hbm [shape: f32[16,32], index: 18, kind: output, shape index: {0}]   ;;  %s1785_s19 = inlined_call_operand.hbm [shape: f32[2,8,8], index: 19, kind: output, shape index: {1}]  }
   0x1   :  { %1788 = sst [smem:[#allocation18_spill]] %s1766_s0 }
   0x2   :  { %1789 = sst [smem:[#allocation19_spill]] %s1767_s1 }
   0x3   :  { %1790 = sst [smem:[#allocation20_spill]] %s1768_s2 }
   0x4   :  { %1791 = sst [smem:[#allocation21_spill]] %s1769_s3 }
   0x5   :  { %25 = vsyncpa [#allocation3], 0 }
   0x6   :  { %26 = vsyncpa [#allocation6], 0 }
   0x7   :  { %27 = vsyncpa [#allocation9], 0 }
   0x8   :  { %28 = vsyncpa [#allocation4], 0 }
   0x9   :  { %29 = vsyncpa [#allocation12], 0  ;;  %s1792_s20 = sld [smem:[#allocation19_spill]]  ;;  %s1379_s1 = smov [#allocation5]  }
   0xa   :  { %s49_s22 = sshll.u32 %s1379_s1, 4  ;;  %s1793_s24 = sld [smem:[#allocation18_spill]]  ;;  %s50_s22 = int_to_ptr.vmem [resolvable:$true] %s49_s22 }
   0xb   :  { %s1380_s3 = smov 128   ;;  %s1381_s26 = smov 8  }
   0xc   :  { %s1382_s27 = smov [#allocation2]   ;;  %s72_s30 = sshll.u32 %s1774_s8, 4  ;;  %s73_s30 = int_to_ptr.hbm [resolvable:$true] %s72_s30 }
   0xd   :  { %s36_s28 = sshll.u32 %s1382_s27, 4  ;;  %s91_s2 = sshll.u32 %s1778_s12, 4  ;;  %s37_s28 = int_to_ptr.vmem [resolvable:$true] %s36_s28  ;;  %s92_s2 = int_to_ptr.hbm [resolvable:$true] %s91_s2 }
   0xe   :  { %s1383_s23 = smov [#allocation7]  }
   0xf   :  { %s47_s21 = sshll.u32 %s1792_s20, 4  ;;  %s48_s21 = int_to_ptr.hbm [resolvable:$true] %s47_s21 }
  0x10   :  { %s34_s25 = sshll.u32 %s1793_s24, 4  ;;  %s74_s24 = sshll.u32 %s1383_s23, 4  ;;  %s35_s25 = int_to_ptr.hbm [resolvable:$true] %s34_s25  ;;  %s75_s24 = int_to_ptr.vmem [resolvable:$true] %s74_s24 }
  0x11   :  { %55 = dma.hbm_to_vmem [thread:$0]  %s48_s21, 256, %s50_s22, [#allocation6], %s1380_s3, %s1380_s3, %s1381_s26  }
  0x12   :  { %42 = dma.hbm_to_vmem [thread:$0]  %s35_s25, 256, %s37_s28, [#allocation3], %s1380_s3, %s1380_s3, %s1381_s26  }
  0x13   :  { %80 = dma.hbm_to_vmem [thread:$0]  %s73_s30, 512, %s75_s24, [#allocation6], %s1380_s3, %s1380_s3, %s1381_s26  }
  0x14   :  { %s1384_s21 = smov [#allocation8]  }
  0x15   :  { %s93_s8 = sshll.u32 %s1384_s21, 4  ;;  %s94_s8 = int_to_ptr.vmem [resolvable:$true] %s93_s8 }
  0x16   :  { %99 = dma.hbm_to_vmem [thread:$0]  %s92_s2, 512, %s94_s8, [#allocation9], %s1380_s3, %s1380_s3, %s1381_s26  }
  0x17   :  { %1369 = dma.done.wait [#allocation3], 256  }
  0x18   :  { %1370 = vsyncadd [#allocation3], 4294967040 }
  0x19   :  { %1371 = dma.done.wait [#allocation6], 768  }
  0x1a   :  { %1372 = vsyncadd [#allocation6], 4294966528 }
  0x1b   :  { %1373 = dma.done.wait [#allocation9], 512  }
  0x1c   :  { %1374 = vsyncadd [#allocation9], 4294966784  ;;  %s1794_s25 = sld [smem:[#allocation21_spill]]  ;;  %v128_v8 = vld [vmem:[#allocation5] sm:$0xff]  ;;  %v1538_v9 = vld [vmem:[#allocation2] sm:$0xff]  ;;  %vm138_vm0 = vcmask 261120  }
  0x1d   :  { %s1795_s29 = sld [smem:[#allocation20_spill]]  ;;  %v1540_v10 = vld [vmem:[#allocation2 + $0x8] sm:$0xff]  ;;  %v208_v11 = vld [vmem:[%s1770_s4 + $0x18] sm:$0xff]  ;;  %v207_v12 = vld [vmem:[%s1770_s4 + $0x10] sm:$0xff]  ;;  %vm242_vm1 = vcmask 64512   ;;  %s1385_s12 = smov 120  }
  0x1e   :  { %v206_v13 = vld [vmem:[%s1770_s4 + $0x8] sm:$0xff]  ;;  %v205_v14 = vld [vmem:[%s1770_s4] sm:$0xff]  ;;  %v129_v21 = vld [vmem:[#allocation5 + $0x8] sm:$0xff]  ;;  %vm995_vm5 = vcmask 523264   ;;  %s1389_s1 = smov [#allocation10]   ;;  %s1084_s21 = sshll.u32 %s1784_s18, 4  ;;  %s1085_s21 = int_to_ptr.hbm [resolvable:$true] %s1084_s21 }
  0x1f   :  { %v1179_v15 = vld [vmem:[%s1772_s6] ss:$0 sm:$0xff]  ;;  %s1386_s6 = smov 112   ;;  %s1082_s2 = sshll.u32 %s1389_s1, 4  ;;  %s1083_s2 = int_to_ptr.vmem [resolvable:$true] %s1082_s2 }
  0x20   :  { %v1180_v16 = vld [vmem:[%s1771_s5] ss:$0 sm:$0xff] }
  0x21   :  { %v1181_v25 = vld [vmem:[%s1773_s7] ss:$0 sm:$0xff]  ;;  %s1387_s7 = smov 104  }
  0x22   :  { %v171_v0 = vld [vmem:[%s1794_s25 + $0x18] sm:$0xff]  ;;  %v170_v2 = vld [vmem:[%s1794_s25 + $0x10] sm:$0xff]  ;;  %v169_v4 = vld [vmem:[%s1794_s25 + $0x8] sm:$0xff] }
  0x23   :  { %v133_v1 = vld [vmem:[%s1795_s29 + $0x18] sm:$0xff]  ;;  %194 = vmatpush.msra.mxu1 %v171_v0  ;;  %v132_v3 = vld [vmem:[%s1795_s29 + $0x10] sm:$0xff]  ;;  %v131_v5 = vld [vmem:[%s1795_s29 + $0x8] sm:$0xff] }
  0x24   :  { %157 = vmatpush.msra.mxu0 %v133_v1  ;;  %1159 = vmatpush.msra.mxu2 %v133_v1  ;;  %v168_v6 = vld [vmem:[%s1794_s25] sm:$0xff] }
  0x25   :  { %195 = vmatpush.msra.mxu1 %v170_v2  ;;  %v130_v7 = vld [vmem:[%s1795_s29] sm:$0xff] }
  0x26   :  { %158 = vmatpush.msra.mxu0 %v132_v3  ;;  %1160 = vmatpush.msra.mxu2 %v132_v3  ;;  %v236_v63 = vld [vmem:[#allocation7] sm:$0xff] }
  0x27   :  { %196 = vmatpush.msra.mxu1 %v169_v4 }
  0x28   :  { %159 = vmatpush.msra.mxu0 %v131_v5  ;;  %1161 = vmatpush.msra.mxu2 %v131_v5 }
  0x29   :  { %197 = vmatpush.msra.mxu1 %v168_v6 }
  0x2a   :  { %160 = vmatpush.msra.mxu0 %v130_v7  ;;  %1119 = vmatmul.msk.f32.vlgmr.msra.gmra.mxu1 %vm138_vm0, %v128_v8 }
  0x2b   :  { %1162 = vmatpush.msra.mxu2 %v130_v7  ;;  %1117 = vmatmul.msk.f32.vlgmr.msra.gmra.mxu0 %vm138_vm0, %v1538_v9 }
  0x2c   :  { %1118 = vmatmul.msk.f32.vlgmr.msra.gmra.mxu2 %vm138_vm0, %v1540_v10 }
  0x2d   :  { %225 = vmatpush.msrb.mxu2 %v208_v11 }
  0x2f   :  { %226 = vmatpush.msrb.mxu2 %v207_v12 }
  0x31   :  { %227 = vmatpush.msrb.mxu2 %v206_v13 }
  0x32   :  { %1120 = vmatmul.msk.f32.gmra.mxu1 %vm138_vm0, %v129_v21 }
  0x33   :  { %228 = vmatpush.msrb.mxu2 %v205_v14 }
  0x34   :  { %1121 = vmatmul.msk.f32.vlgmr.msrb.gmra.mxu2 %vm138_vm0, %v128_v8  ;;  %v237_v8 = vld [vmem:[#allocation7 + $0x8] sm:$0xff] }
  0x3c   :  { %1122 = vmatmul.msk.f32.gmra.mxu2 %vm138_vm0, %v129_v21 }
  0xa7   :  { %v199_v17 = vpop.f32.mrf.mxu1 }
  0xa8   :  { %v1566_v18 = vadd.f32 %v1179_v15, %v199_v17  ;;  %v162_v19 = vpop.f32.mrf.mxu0 }
  0xa9   :  { %v163_v20 = vadd.f32 %v1180_v16, %v162_v19 }
  0xaa   :  { %367 = vrot.lane.b32.xlu0 %v1566_v18, %s1385_s12  ;;  %1123 = vmatpush.xpose.msk.msra.mxu3 %vm242_vm1, %v1566_v18 }
  0xab   :  { %v1572_v22 = vmul.f32 0.35355338, %v163_v20 }
  0xad   :  { %1124 = vmatmul.msk.f32.vlgmr.msra.gmra.mxu3 %vm242_vm1, %v1572_v22 }
  0xaf   :  { %v165_v23 = vpop.f32.mrf.mxu2  ;;  %v202_v30 = vpop.f32.mrf.mxu1 }
  0xb0   :  { %v166_v24 = vadd.f32 %v1180_v16, %v165_v23  ;;  %v1593_v31 = vadd.f32 %v1179_v15, %v202_v30 }
  0xb2   :  { %365 = vrot.lane.b32.xlu0 %v1572_v22, %s1385_s12  ;;  %v1595_v32 = vmul.f32 0.35355338, %v166_v24  ;;  %1125 = vmatpush.xpose.msk.msrb.mxu3 %vm242_vm1, %v1593_v31 }
  0xb5   :  { %1126 = vmatmul.msk.f32.vlgmr.msrb.gmra.mxu3 %vm242_vm1, %v1595_v32 }
  0xb7   :  { %v230_v26 = vpop.f32.mrf.mxu2 }
  0xb8   :  { %v1583_v27 = vadd.f32 %v1181_v25, %v230_v26 }
  0xba   :  { %446 = vrot.lane.b32.xlu0 %v1583_v27, %s1385_s12  ;;  %337 = vmatpush.msra.mxu3 %v1583_v27 }
  0xbf   :  { %v233_v45 = vpop.f32.mrf.mxu2 }
  0xc0   :  { %v1608_v46 = vadd.f32 %v1181_v25, %v233_v45 }
  0xc2   :  { %559 = vrot.lane.b32.xlu0 %v1566_v18, %s1386_s6  ;;  %360 = vmatpush.msrb.mxu0 %v1608_v46 }
  0xca   :  { %557 = vrot.lane.b32.xlu0 %v1572_v22, %s1386_s6 }
 0x11c   :  { %v368_v28 = vpop.permute.xlu0 %367 }
 0x11d   :  { %1129 = vmatpush.xpose.msk.msrb.mxu1 %vm242_vm1, %v368_v28 }
 0x121   :  { %520 = vmatpush.msra.mxu1 %v237_v8 }
 0x124   :  { %v366_v29 = vpop.permute.xlu0 %365 }
 0x125   :  { %1130 = vmatmul.msk.f32.vlgmr.msrb.gmra.mxu1 %vm242_vm1, %v366_v29 }
 0x12c   :  { %v447_v33 = vpop.permute.xlu0 %446 }
 0x12d   :  { %467 = vmatpush.msrb.mxu3 %v447_v33 }
 0x130   :  { %v266_v34 = vpop.f32.mrf.mxu3 }
 0x131   :  { %v295_v35 = vsel %vm242_vm1, %v266_v34, -inf }
 0x132   :  { %296 = vmax.xlane.f32.xlu1 %v295_v35 }
 0x134   :  { %v560_v55 = vpop.permute.xlu0 %559 }
 0x138   :  { %v292_v43 = vpop.f32.mrf.mxu3 }
 0x139   :  { %v298_v44 = vsel %vm242_vm1, %v292_v43, -inf }
 0x13a   :  { %299 = vmax.xlane.f32.xlu0 %v298_v44  ;;  %v238_v44 = vld [vmem:[#allocation7 + $0x10] sm:$0xff] }
 0x13b   :  { %710 = vmatpush.msrb.mxu1 %v238_v44 }
 0x13c   :  { %v558_v57 = vpop.permute.xlu0 %557 }
 0x1a2   :  { %v390_v36 = vpop.f32.mrf.mxu1 }
 0x1a3   :  { %v421_v37 = vsel %vm242_vm1, %v390_v36, -inf }
 0x1a4   :  { %422 = vmax.xlane.f32.xlu1 %v421_v37 }
 0x1a5   :  { %v297_v38 = vpop.xlane.xlu1 %296 }
 0x1a6   :  { %v301_v39 = vsub.f32 %v266_v34, %v297_v38 }
 0x1a8   :  { %v303_v40 = vmul.f32 1.442695, %v301_v39 }
 0x1aa   :  { %1189 = vpow2.f32 %v303_v40 }
 0x1ad   :  { %v300_v58 = vpop.xlane.xlu0 %299 }
 0x1ae   :  { %v302_v59 = vsub.f32 %v292_v43, %v300_v58 }
 0x1b0   :  { %v1190_v41 = vpop.eup %1189  ;;  %v305_v60 = vmul.f32 1.442695, %v302_v59 }
 0x1b1   :  { %v307_v42 = vsel %vm242_vm1, %v1190_v41, 0.0 }
 0x1b2   :  { %308 = vadd.xlane.f32.xlu2 %v307_v42 }
 0x1bd   :  { %395 = vrot.lane.b32.xlu1 %v1593_v31, %s1385_s12 }
 0x217   :  { %v423_v47 = vpop.xlane.xlu1 %422 }
 0x218   :  { %v427_v48 = vsub.f32 %v390_v36, %v423_v47 }
 0x21a   :  { %v429_v49 = vmul.f32 1.442695, %v427_v48 }
 0x21c   :  { %1191 = vpow2.f32 %v429_v49 }
 0x222   :  { %v1192_v50 = vpop.eup %1191 }
 0x223   :  { %v433_v51 = vsel %vm242_vm1, %v1192_v50, 0.0 }
 0x224   :  { %434 = vadd.xlane.f32.xlu2 %v433_v51 }
 0x225   :  { %v309_v52 = vpop.xlane.xlu2 %308 }
 0x226   :  { %1193 = vrcp.f32 %v309_v52 }
 0x227   :  { %1195 = vpow2.f32 %v305_v60 }
 0x22c   :  { %v1194_v53 = vpop.eup %1193 }
 0x22d   :  { %v1612_v54 = vmul.f32 %v1194_v53, %v1190_v41  ;;  %v1196_v61 = vpop.eup %1195 }
 0x22e   :  { %v310_v62 = vsel %vm242_vm1, %v1196_v61, 0.0 }
 0x22f   :  { %1127 = vmatmul.msk.f32.vlgmr.msra.gmra.mxu3 %vm242_vm1, %v1612_v54  ;;  %v396_v56 = vpop.permute.xlu1 %395 }
 0x230   :  { %1139 = vmatpush.xpose.msk.msra.mxu3 %vm242_vm1, %v560_v55  ;;  %1131 = vmatpush.xpose.msk.msra.mxu2 %vm242_vm1, %v396_v56 }
 0x234   :  { %549 = vmatpush.msrb.mxu2 %v236_v63 }
 0x23c   :  { %393 = vrot.lane.b32.xlu2 %v1595_v32, %s1385_s12 }
 0x265   :  { %311 = vadd.xlane.f32.xlu2 %v310_v62 }
 0x297   :  { %v435_v0 = vpop.xlane.xlu2 %434 }
 0x298   :  { %1197 = vrcp.f32 %v435_v0 }
 0x29e   :  { %v1198_v1 = vpop.eup %1197 }
 0x29f   :  { %v441_v2 = vmul.f32 %v1198_v1, %v1192_v50  ;;  %v394_v3 = vpop.permute.xlu2 %393 }
 0x2a0   :  { %1132 = vmatmul.msk.f32.vlgmr.msra.gmra.mxu2 %vm242_vm1, %v394_v3 }
 0x2a1   :  { %1133 = vmatmul.msk.f32.vlgmr.msrb.gmra.mxu3 %vm242_vm1, %v441_v2  ;;  %v443_v38 = vadd.f32 %v441_v2, %v1612_v54 }
 0x2a9   :  { %1140 = vmatmul.msk.f32.vlgmr.msra.gmra.mxu3 %vm242_vm1, %v558_v57 }
 0x2b2   :  { %v339_v4 = vpop.f32.mrf.mxu3 }
 0x2b3   :  { %1137 = vmatmul.msk.f32.vlgmr.msrb.gmra.mxu2 %vm242_vm1, %v339_v4 }
 0x2d8   :  { %v312_v5 = vpop.xlane.xlu2 %311 }
 0x2d9   :  { %1199 = vrcp.f32 %v312_v5 }
 0x2df   :  { %v1200_v6 = vpop.eup %1199 }
 0x2e0   :  { %v1625_v7 = vmul.f32 %v1200_v6, %v1196_v61 }
 0x2e2   :  { %1128 = vmatmul.msk.f32.vlgmr.msrb.gmra.mxu0 %vm242_vm1, %v1625_v7 }
 0x323   :  { %v418_v11 = vpop.f32.mrf.mxu2 }
 0x324   :  { %v469_v12 = vpop.f32.mrf.mxu3  ;;  %v424_v13 = vsel %vm242_vm1, %v418_v11, -inf }
 0x325   :  { %425 = vmax.xlane.f32.xlu1 %v424_v13  ;;  %1135 = vmatmul.msk.f32.vlgmr.msra.gmra.mxu1 %vm242_vm1, %v469_v12 }
 0x32c   :  { %v582_v14 = vpop.f32.mrf.mxu3 }
 0x32d   :  { %v613_v15 = vsel %vm242_vm1, %v582_v14, -inf }
 0x32e   :  { %614 = vmax.xlane.f32.xlu2 %v613_v15 }
 0x336   :  { %v1667_v49 = vpop.f32.mrf.mxu2 }
 0x33e   :  { %587 = vrot.lane.b32.xlu1 %v1593_v31, %s1386_s6 }
 0x346   :  { %473 = vrot.lane.b32.xlu2 %v1608_v46, %s1385_s12 }
 0x34e   :  { %585 = vrot.lane.b32.xlu2 %v1595_v32, %s1386_s6 }
 0x356   :  { %748 = vrot.lane.b32.xlu2 %v1595_v32, %s1387_s7 }
 0x35f   :  { %v362_v16 = vpop.f32.mrf.mxu0 }
 0x360   :  { %1138 = vmatmul.msk.f32.gmra.mxu2 %vm242_vm1, %v362_v16 }
 0x398   :  { %v426_v17 = vpop.xlane.xlu1 %425 }
 0x399   :  { %v428_v19 = vsub.f32 %v418_v11, %v426_v17  ;;  %v1174_v11 = vpack.i.bf16 %v1608_v46, %v1583_v27 }
 0x39b   :  { %v431_v20 = vmul.f32 1.442695, %v428_v19 }
 0x39d   :  { %1201 = vpow2.f32 %v431_v20 }
 0x3a1   :  { %v615_v21 = vpop.xlane.xlu2 %614 }
 0x3a2   :  { %v619_v23 = vsub.f32 %v582_v14, %v615_v21 }
 0x3a3   :  { %v1202_v24 = vpop.eup %1201 }
 0x3a4   :  { %v621_v25 = vmul.f32 1.442695, %v619_v23  ;;  %v436_v26 = vsel %vm242_vm1, %v1202_v24, 0.0 }
 0x3a5   :  { %437 = vadd.xlane.f32.xlu0 %v436_v26 }
 0x3a6   :  { %1203 = vpow2.f32 %v621_v25 }
 0x3a9   :  { %v474_v28 = vpop.permute.xlu2 %473 }
 0x3aa   :  { %494 = vmatpush.msra.mxu0 %v474_v28 }
 0x3ac   :  { %v1204_v29 = vpop.eup %1203 }
 0x3ad   :  { %v625_v30 = vsel %vm242_vm1, %v1204_v29, 0.0 }
 0x3ae   :  { %626 = vadd.xlane.f32.xlu1 %v625_v30 }
 0x3b0   :  { %v588_v32 = vpop.permute.xlu1 %587 }
 0x3b1   :  { %1141 = vmatpush.xpose.msk.msrb.mxu0 %vm242_vm1, %v588_v32  ;;  %v239_v32 = vld [vmem:[#allocation7 + $0x18] sm:$0xff] }
 0x3b9   :  { %637 = vrot.lane.b32.xlu0 %v1583_v27, %s1386_s6 }
 0x3c1   :  { %722 = vrot.lane.b32.xlu0 %v1566_v18, %s1387_s7  ;;  %v586_v18 = vpop.permute.xlu2 %585 }
 0x3c7   :  { %750 = vrot.lane.b32.xlu1 %v1593_v31, %s1387_s7 }
 0x3c9   :  { %720 = vrot.lane.b32.xlu0 %v1572_v22, %s1387_s7  ;;  %v749_v43 = vpop.permute.xlu2 %748 }
 0x3e3   :  { %v1670_v51 = vpop.f32.mrf.mxu2 }
 0x418   :  { %v438_v33 = vpop.xlane.xlu0 %437 }
 0x419   :  { %1205 = vrcp.f32 %v438_v33 }
 0x41f   :  { %v1206_v34 = vpop.eup %1205 }
 0x420   :  { %v1652_v35 = vmul.f32 %v1206_v34, %v1202_v24 }
 0x421   :  { %v627_v36 = vpop.xlane.xlu1 %626 }
 0x422   :  { %1207 = vrcp.f32 %v627_v36  ;;  %1134 = vmatmul.msk.f32.vlgmr.msra.gmra.mxu0 %vm242_vm1, %v1652_v35  ;;  %v444_v19 = vadd.f32 %v1652_v35, %v1625_v7  ;;  %v522_v35 = vpop.f32.mrf.mxu1 }
 0x428   :  { %v1208_v37 = vpop.eup %1207 }
 0x429   :  { %v633_v39 = vmul.f32 %v1208_v37, %v1204_v29 }
 0x42a   :  { %1142 = vmatmul.msk.f32.vlgmr.msrb.gmra.mxu0 %vm242_vm1, %v586_v18 }
 0x42b   :  { %v1658_v31 = vadd.f32 %v633_v39, %v443_v38  ;;  %v638_v22 = vpop.permute.xlu0 %637  ;;  %v552_v38 = vadd.f32 %v1667_v49, %v522_v35 }
 0x42c   :  { %658 = vmatpush.msrb.mxu3 %v638_v22  ;;  %v1182_v22 = vld [vmem:[%s1775_s9] ss:$0 sm:$0xff]  ;;  %s1388_s9 = smov [#allocation11]  }
 0x42d   :  { %1143 = vmatmul.msk.f32.vlgmr.msrb.gmra.mxu3 %vm242_vm1, %v633_v39  ;;  %s1095_s28 = sshll.u32 %s1388_s9, 4  ;;  %s1096_s28 = int_to_ptr.vmem [resolvable:$true] %s1095_s28 }
 0x433   :  { %v723_v40 = vpop.permute.xlu0 %722 }
 0x434   :  { %1147 = vmatpush.xpose.msk.msra.mxu2 %vm242_vm1, %v723_v40 }
 0x439   :  { %v751_v41 = vpop.permute.xlu1 %750 }
 0x43a   :  { %1149 = vmatpush.xpose.msk.msra.mxu3 %vm242_vm1, %v751_v41 }
 0x43b   :  { %v721_v42 = vpop.permute.xlu0 %720 }
 0x43c   :  { %1148 = vmatmul.msk.f32.vlgmr.msra.gmra.mxu2 %vm242_vm1, %v721_v42 }
 0x43d   :  { %1150 = vmatmul.msk.f32.vlgmr.msra.gmra.mxu3 %vm242_vm1, %v749_v43 }
 0x43e   :  { %873 = vmatpush.msrb.mxu3 %v239_v32 }
 0x49f   :  { %v496_v45 = vpop.f32.mrf.mxu0 }
 0x4a0   :  { %1136 = vmatmul.msk.f32.gmra.mxu1 %vm242_vm1, %v496_v45 }
 0x4a7   :  { %v610_v47 = vpop.f32.mrf.mxu0 }
 0x4a8   :  { %v616_v48 = vsel %vm242_vm1, %v610_v47, -inf }
 0x4a9   :  { %617 = vmax.xlane.f32.xlu1 %v616_v48 }
 0x4b0   :  { %v660_v50 = vpop.f32.mrf.mxu3 }
 0x4b1   :  { %1145 = vmatmul.msk.f32.vlgmr.msrb.gmra.mxu1 %vm242_vm1, %v660_v50 }
 0x4bf   :  { %v745_v52 = vpop.f32.mrf.mxu2 }
 0x4c0   :  { %v773_v53 = vpop.f32.mrf.mxu3  ;;  %v776_v54 = vsel %vm242_vm1, %v745_v52, -inf }
 0x4c1   :  { %777 = vmax.xlane.f32.xlu0 %v776_v54  ;;  %v779_v55 = vsel %vm242_vm1, %v773_v53, -inf }
 0x4c2   :  { %780 = vmax.xlane.f32.xlu2 %v779_v55 }
 0x4da   :  { %663 = vrot.lane.b32.xlu2 %v1608_v46, %s1386_s6 }
 0x51c   :  { %v618_v56 = vpop.xlane.xlu1 %617 }
 0x51d   :  { %v620_v57 = vsub.f32 %v610_v47, %v618_v56  ;;  %v525_v36 = vpop.f32.mrf.mxu1 }
 0x51e   :  { %v555_v41 = vadd.f32 %v1670_v51, %v525_v36 }
 0x51f   :  { %v623_v58 = vmul.f32 1.442695, %v620_v57 }
 0x521   :  { %1209 = vpow2.f32 %v623_v58 }
 0x527   :  { %v1210_v59 = vpop.eup %1209 }
 0x528   :  { %v628_v60 = vsel %vm242_vm1, %v1210_v59, 0.0 }
 0x529   :  { %629 = vadd.xlane.f32.xlu1 %v628_v60 }
 0x52e   :  { %v712_v37 = vpop.f32.mrf.mxu1 }
 0x52f   :  { %v718_v39 = vadd.f32 %v712_v37, %v552_v38  ;;  %v985_v37 = vld [vmem:[%s1780_s14 + $0x10] sm:$0xff]  ;;  %v984_v38 = vld [vmem:[%s1780_s14 + $0x8] sm:$0xff] }
 0x534   :  { %v778_v61 = vpop.xlane.xlu0 %777 }
 0x535   :  { %v782_v62 = vsub.f32 %v745_v52, %v778_v61  ;;  %v781_v63 = vpop.xlane.xlu2 %780 }
 0x536   :  { %v783_v0 = vsub.f32 %v773_v53, %v781_v63 }
 0x537   :  { %v784_v1 = vmul.f32 1.442695, %v782_v62 }
 0x538   :  { %v786_v2 = vmul.f32 1.442695, %v783_v0 }
 0x539   :  { %1211 = vpow2.f32 %v784_v1 }
 0x53a   :  { %1213 = vpow2.f32 %v786_v2  ;;  %v947_v2 = vld [vmem:[#allocation8 + $0x18] sm:$0xff] }
 0x53d   :  { %v664_v3 = vpop.permute.xlu2 %663 }
 0x53e   :  { %684 = vmatpush.msra.mxu0 %v664_v3 }
 0x53f   :  { %v1212_v4 = vpop.eup %1211 }
 0x540   :  { %v1214_v5 = vpop.eup %1213  ;;  %v788_v6 = vsel %vm242_vm1, %v1212_v4, 0.0 }
 0x541   :  { %789 = vadd.xlane.f32.xlu0 %v788_v6  ;;  %v791_v8 = vsel %vm242_vm1, %v1214_v5, 0.0 }
 0x542   :  { %792 = vadd.xlane.f32.xlu1 %v791_v8  ;;  %v944_v8 = vld [vmem:[#allocation8] sm:$0xff] }
 0x555   :  { %1175 = vrot.lane.b32.xlu0 %v1174_v11, %s1387_s7 }
 0x59c   :  { %v630_v12 = vpop.xlane.xlu1 %629 }
 0x59d   :  { %1215 = vrcp.f32 %v630_v12 }
 0x5a3   :  { %v1216_v13 = vpop.eup %1215 }
 0x5a4   :  { %v634_v14 = vmul.f32 %v1216_v13, %v1210_v59 }
 0x5a6   :  { %1144 = vmatmul.msk.f32.vlgmr.msra.gmra.mxu0 %vm242_vm1, %v634_v14  ;;  %v636_v23 = vadd.f32 %v634_v14, %v444_v19  ;;  %v988_v19 = vld [vmem:[%s1780_s14 + $0x28] sm:$0xff] }
 0x5b4   :  { %v790_v15 = vpop.xlane.xlu0 %789 }
 0x5b5   :  { %1217 = vrcp.f32 %v790_v15  ;;  %v793_v16 = vpop.xlane.xlu1 %792 }
 0x5b6   :  { %1219 = vrcp.f32 %v793_v16  ;;  %v990_v16 = vld [vmem:[%s1780_s14 + $0x38] sm:$0xff] }
 0x5b7   :  { %1010 = vmatpush.msra.mxu1 %v990_v16 }
 0x5bb   :  { %v1218_v17 = vpop.eup %1217 }
 0x5bc   :  { %v1220_v20 = vpop.eup %1219  ;;  %v796_v21 = vmul.f32 %v1218_v17, %v1212_v4  ;;  %v946_v4 = vld [vmem:[#allocation8 + $0x10] sm:$0xff] }
 0x5bd   :  { %v797_v27 = vmul.f32 %v1220_v20, %v1214_v5  ;;  %v945_v5 = vld [vmem:[#allocation8 + $0x8] sm:$0xff]  ;;  %v989_v17 = vld [vmem:[%s1780_s14 + $0x30] sm:$0xff]  ;;  %v987_v20 = vld [vmem:[%s1780_s14 + $0x20] sm:$0xff] }
 0x5be   :  { %v798_v46 = vadd.f32 %v796_v21, %v1658_v31  ;;  %1011 = vmatpush.msra.mxu1 %v989_v17 }
 0x5bf   :  { %v799_v24 = vadd.f32 %v797_v27, %v636_v23  ;;  %v986_v23 = vld [vmem:[%s1780_s14 + $0x18] sm:$0xff] }
 0x5c0   :  { %v889_v25 = vmul.f32 0.25, %v798_v46  ;;  %1012 = vmatpush.msra.mxu1 %v988_v19 }
 0x5c1   :  { %v890_v26 = vmul.f32 0.25, %v799_v24 }
 0x5c2   :  { %891 = vst.msk [vmem:[#allocation11] sm:$0xff] %vm242_vm1, %v889_v25  ;;  %1013 = vmatpush.msra.mxu1 %v987_v20 }
 0x5c3   :  { %892 = vst.msk [vmem:[#allocation11 + $0x8] sm:$0xff] %vm242_vm1, %v890_v26 }
 0x5c4   :  { %1014 = vmatpush.msra.mxu1 %v986_v23 }
 0x5c6   :  { %1015 = vmatpush.msra.mxu1 %v985_v37 }
 0x5c7   :  { %v1176_v28 = vpop.permute.xlu0 %1175 }
 0x5c8   :  { %v1178_v29 = vunpack.i.h.bf16 %v1176_v28  ;;  %v1177_v30 = vunpack.i.l.bf16 %v1176_v28  ;;  %v1183_v28 = vld [vmem:[%s1776_s10] ss:$0 sm:$0xff]  ;;  %1016 = vmatpush.msra.mxu1 %v984_v38 }
 0x5ca   :  { %821 = vmatpush.msrb.mxu0 %v1177_v30  ;;  %847 = vmatpush.msrb.mxu2 %v1178_v29 }
 0x5cb   :  { %1151 = vmatmul.msk.f32.vlgmr.msrb.gmra.mxu0 %vm242_vm1, %v796_v21  ;;  %1152 = vmatmul.msk.f32.vlgmr.msrb.gmra.mxu2 %vm242_vm1, %v797_v27 }
 0x5cc   :  { %970 = vmatpush.msra.mxu0 %v947_v2 }
 0x5ce   :  { %971 = vmatpush.msra.mxu0 %v946_v4 }
 0x5d0   :  { %972 = vmatpush.msra.mxu0 %v945_v5 }
 0x5d2   :  { %973 = vmatpush.msra.mxu0 %v944_v8 }
 0x623   :  { %v686_v7 = vpop.f32.mrf.mxu0 }
 0x624   :  { %1146 = vmatmul.msk.f32.gmra.mxu1 %vm242_vm1, %v686_v7  ;;  %v1184_v7 = vld [vmem:[%s1777_s11] ss:$0 sm:$0xff] }
 0x648   :  { %v823_v33 = vpop.f32.mrf.mxu0 }
 0x649   :  { %1153 = vmatmul.msk.f32.vlgmr.msrb.gmra.mxu3 %vm242_vm1, %v823_v33 }
 0x64e   :  { %v849_v34 = vpop.f32.mrf.mxu2 }
 0x651   :  { %1154 = vmatmul.msk.f32.gmra.mxu3 %vm242_vm1, %v849_v34 }
 0x6a1   :  { %v715_v40 = vpop.f32.mrf.mxu1 }
 0x6a2   :  { %v719_v42 = vadd.f32 %v715_v40, %v555_v41 }
 0x6cc   :  { %v875_v18 = vpop.f32.mrf.mxu3 }
 0x6cd   :  { %v881_v31 = vadd.f32 %v875_v18, %v718_v39  ;;  %v983_v18 = vld [vmem:[%s1780_s14] sm:$0xff]  ;;  %s1097_s14 = sshll.u32 %s1785_s19, 4  ;;  %s1098_s14 = int_to_ptr.hbm [resolvable:$true] %s1097_s14 }
 0x6ce   :  { %1017 = vmatpush.msra.mxu1 %v983_v18  ;;  %v1185_v39 = vld [vmem:[%s1779_s13] ss:$0 sm:$0xff] }
 0x6cf   :  { %v887_v43 = vadd.f32 %v1182_v22, %v881_v31  ;;  %1103 = dma.vmem_to_hbm [thread:$0]  %s1096_s28, 256, %s1098_s14, [#allocation12], %s1380_s3, %s1380_s3, %s1381_s26  }
 0x6d1   :  { %v893_v47 = vadd.f32 %v887_v43, %v1538_v9 }
 0x6d3   :  { %v895_v49 = vsel %vm138_vm0, %v893_v47, 0.0 }
 0x6d4   :  { %v878_v44 = vpop.f32.mrf.mxu3 }
 0x6d5   :  { %v882_v45 = vadd.f32 %v878_v44, %v719_v42 }
 0x6d7   :  { %v888_v48 = vadd.f32 %v1182_v22, %v882_v45  ;;  %v1186_v45 = vld [vmem:[%s1781_s15] ss:$0 sm:$0xff] }
 0x6d9   :  { %v894_v50 = vadd.f32 %v888_v48, %v1540_v10 }
 0x6db   :  { %v896_v52 = vsel %vm138_vm0, %v894_v50, 0.0 }
 0x6dc   :  { %v897_v53 = vadd.f32 %v896_v52, %v895_v49 }
 0x6de   :  { %v898_v54 = vrot.slane %v897_v53, 4 }
 0x6e0   :  { %v899_v55 = vadd.f32 %v898_v54, %v897_v53 }
 0x6e2   :  { %v900_v56 = vrot.slane %v899_v55, 2 }
 0x6e4   :  { %v901_v57 = vadd.f32 %v900_v56, %v899_v55 }
 0x6e6   :  { %v902_v58 = vrot.slane %v901_v57, 1 }
 0x6e8   :  { %v903_v51 = vadd.f32 %v902_v58, %v901_v57 }
 0x6ea   :  { %v904_v59 = vmul.f32 0.0625, %v903_v51 }
 0x6ec   :  { %v905_v60 = vsub.f32 %v893_v47, %v904_v59  ;;  %v906_v61 = vsub.f32 %v894_v50, %v904_v59 }
 0x6ee   :  { %v907_v62 = vmul.f32 %v905_v60, %v905_v60  ;;  %v908_v63 = vmul.f32 %v906_v61, %v906_v61 }
 0x6f0   :  { %v909_v9 = vsel %vm138_vm0, %v907_v62, 0.0  ;;  %v910_v10 = vsel %vm138_vm0, %v908_v63, 0.0 }
 0x6f1   :  { %v911_v0 = vadd.f32 %v910_v10, %v909_v9 }
 0x6f3   :  { %v912_v1 = vrot.slane %v911_v0, 4 }
 0x6f5   :  { %v913_v3 = vadd.f32 %v912_v1, %v911_v0 }
 0x6f7   :  { %v914_v6 = vrot.slane %v913_v3, 2 }
 0x6f9   :  { %v915_v11 = vadd.f32 %v914_v6, %v913_v3 }
 0x6fb   :  { %v916_v12 = vrot.slane %v915_v11, 1 }
 0x6fd   :  { %v917_v13 = vadd.f32 %v916_v12, %v915_v11 }
 0x6ff   :  { %v918_v14 = vmul.f32 0.0625, %v917_v13 }
 0x701   :  { %v919_v15 = vadd.f32 1e-05, %v918_v14 }
 0x703   :  { %1221 = vrsqrt.f32 %v919_v15  ;;  %vm926_vm3 = vweird.f32 %v919_v15 }
 0x709   :  { %v1222_v21 = vpop.eup %1221 }
 0x70a   :  { %v921_v27 = vmul.f32 %v1222_v21, %v919_v15  ;;  %vm927_vm2 = vweird.f32 %v1222_v21 }
 0x70b   :  { %vm928_vm4 = vmor %vm926_vm3, %vm927_vm2 }
 0x70c   :  { %v922_v46 = vmul.f32 %v1222_v21, %v921_v27 }
 0x70e   :  { %v923_v24 = vmul.f32 0.5, %v922_v46 }
 0x710   :  { %v924_v25 = vsub.f32 1.5, %v923_v24  ;;  %v1188_v24 = vld [vmem:[%s1783_s17] ss:$0 sm:$0xff] }
 0x712   :  { %v925_v26 = vmul.f32 %v1222_v21, %v924_v25 }
 0x714   :  { %v929_v29 = vsel %vm928_vm4, %v1222_v21, %v925_v26  ;;  %v1187_v21 = vld [vmem:[%s1782_s16] ss:$0 sm:$0xff] }
 0x715   :  { %v930_v30 = vmul.f32 %v929_v29, %v905_v60  ;;  %v931_v34 = vmul.f32 %v929_v29, %v906_v61 }
 0x717   :  { %v936_v32 = vmul.f32 %v1183_v28, %v930_v30  ;;  %v937_v35 = vmul.f32 %v1183_v28, %v931_v34 }
 0x719   :  { %v942_v33 = vadd.f32 %v1184_v7, %v936_v32  ;;  %v943_v36 = vadd.f32 %v1184_v7, %v937_v35 }
 0x71b   :  { %1155 = vmatmul.msk.f32.vlgmr.msra.gmra.mxu0 %vm138_vm0, %v942_v33 }
 0x723   :  { %1156 = vmatmul.msk.f32.gmra.mxu0 %vm138_vm0, %v943_v36 }
 0x798   :  { %v975_v31 = vpop.f32.mrf.mxu0 }
 0x799   :  { %v976_v22 = vadd.f32 %v1185_v39, %v975_v31 }
 0x79b   :  { %v981_v40 = vmax.f32 %v976_v22, 0.0 }
 0x79d   :  { %1157 = vmatmul.msk.f32.vlgmr.msra.gmra.mxu1 %vm995_vm5, %v981_v40 }
 0x7a0   :  { %v978_v41 = vpop.f32.mrf.mxu0 }
 0x7a1   :  { %v979_v42 = vadd.f32 %v1185_v39, %v978_v41 }
 0x7a3   :  { %v982_v43 = vmax.f32 %v979_v42, 0.0 }
 0x7a5   :  { %1158 = vmatmul.msk.f32.gmra.mxu1 %vm995_vm5, %v982_v43 }
 0x81a   :  { %v1019_v44 = vpop.f32.mrf.mxu1 }
 0x81b   :  { %v1020_v47 = vadd.f32 %v1186_v45, %v1019_v44 }
 0x81d   :  { %v1025_v50 = vadd.f32 %v1020_v47, %v942_v33 }
 0x81f   :  { %v1027_v53 = vsel %vm138_vm0, %v1025_v50, 0.0 }
 0x822   :  { %v1022_v48 = vpop.f32.mrf.mxu1 }
 0x823   :  { %v1023_v49 = vadd.f32 %v1186_v45, %v1022_v48 }
 0x825   :  { %v1026_v52 = vadd.f32 %v1023_v49, %v943_v36 }
 0x827   :  { %v1028_v54 = vsel %vm138_vm0, %v1026_v52, 0.0 }
 0x828   :  { %v1029_v55 = vadd.f32 %v1028_v54, %v1027_v53 }
 0x82a   :  { %v1030_v56 = vrot.slane %v1029_v55, 4 }
 0x82c   :  { %v1031_v57 = vadd.f32 %v1030_v56, %v1029_v55 }
 0x82e   :  { %v1032_v58 = vrot.slane %v1031_v57, 2 }
 0x830   :  { %v1033_v51 = vadd.f32 %v1032_v58, %v1031_v57 }
 0x832   :  { %v1034_v59 = vrot.slane %v1033_v51, 1 }
 0x834   :  { %v1035_v60 = vadd.f32 %v1034_v59, %v1033_v51 }
 0x836   :  { %v1036_v61 = vmul.f32 0.0625, %v1035_v60 }
 0x838   :  { %v1037_v62 = vsub.f32 %v1025_v50, %v1036_v61  ;;  %v1038_v63 = vsub.f32 %v1026_v52, %v1036_v61 }
 0x83a   :  { %v1039_v9 = vmul.f32 %v1037_v62, %v1037_v62  ;;  %v1040_v10 = vmul.f32 %v1038_v63, %v1038_v63 }
 0x83c   :  { %v1041_v0 = vsel %vm138_vm0, %v1039_v9, 0.0  ;;  %v1042_v1 = vsel %vm138_vm0, %v1040_v10, 0.0 }
 0x83d   :  { %v1043_v2 = vadd.f32 %v1042_v1, %v1041_v0 }
 0x83f   :  { %v1044_v3 = vrot.slane %v1043_v2, 4 }
 0x841   :  { %v1045_v4 = vadd.f32 %v1044_v3, %v1043_v2 }
 0x843   :  { %v1046_v5 = vrot.slane %v1045_v4, 2 }
 0x845   :  { %v1047_v6 = vadd.f32 %v1046_v5, %v1045_v4 }
 0x847   :  { %v1048_v8 = vrot.slane %v1047_v6, 1 }
 0x849   :  { %v1049_v11 = vadd.f32 %v1048_v8, %v1047_v6 }
 0x84b   :  { %v1050_v12 = vmul.f32 0.0625, %v1049_v11 }
 0x84d   :  { %v1051_v13 = vadd.f32 1e-05, %v1050_v12 }
 0x84f   :  { %1223 = vrsqrt.f32 %v1051_v13  ;;  %vm1058_vm7 = vweird.f32 %v1051_v13 }
 0x855   :  { %v1224_v14 = vpop.eup %1223 }
 0x856   :  { %v1053_v15 = vmul.f32 %v1224_v14, %v1051_v13  ;;  %vm1059_vm6 = vweird.f32 %v1224_v14 }
 0x857   :  { %vm1060_vm8 = vmor %vm1058_vm7, %vm1059_vm6 }
 0x858   :  { %v1054_v16 = vmul.f32 %v1224_v14, %v1053_v15 }
 0x85a   :  { %v1055_v17 = vmul.f32 0.5, %v1054_v16 }
 0x85c   :  { %v1056_v19 = vsub.f32 1.5, %v1055_v17 }
 0x85e   :  { %v1057_v20 = vmul.f32 %v1224_v14, %v1056_v19 }
 0x860   :  { %v1061_v23 = vsel %vm1060_vm8, %v1224_v14, %v1057_v20 }
 0x861   :  { %v1062_v27 = vmul.f32 %v1061_v23, %v1037_v62  ;;  %v1063_v46 = vmul.f32 %v1061_v23, %v1038_v63 }
 0x863   :  { %v1068_v25 = vmul.f32 %v1187_v21, %v1062_v27  ;;  %v1069_v26 = vmul.f32 %v1187_v21, %v1063_v46 }
 0x865   :  { %v1074_v28 = vadd.f32 %v1188_v24, %v1068_v25  ;;  %v1075_v29 = vadd.f32 %v1188_v24, %v1069_v26 }
 0x867   :  { %1076 = vst.msk [vmem:[#allocation10] sm:$0xff] %vm138_vm0, %v1074_v28 }
 0x868   :  { %1077 = vst.msk [vmem:[#allocation10 + $0x8] sm:$0xff] %vm138_vm0, %v1075_v29 }
 0x869   :  { %1090 = dma.vmem_to_hbm [thread:$0]  %s1083_s2, 256, %s1085_s21, [#allocation4], %s1380_s3, %s1380_s3, %s1381_s26  }
 0x86a   :  { %1375 = dma.done.wait [#allocation4], 256  }
 0x86b   :  { %1376 = vsyncadd [#allocation4], 4294967040 }
 0x86c   :  { %1377 = dma.done.wait [#allocation12], 256  }
 0x86d   :  { %1378 = vsyncadd [#allocation12], 4294967040 }
 0x86e   :  { %1112 = vsyncpa [#allocation3], 1 }
 0x86f   :  { %1113 = vsyncpa [#allocation6], 1 }
 0x870   :  { %1114 = vsyncpa [#allocation9], 1 }
 0x871   :  { %1115 = vsyncpa [#allocation4], 1 }
 0x872   :  { %1116 = vsyncpa [#allocation12], 1 }

</bundles_post_ra>
